<compile_context>
chip_gen: v7x
topology: tpu7x:2x2x1
jax: 0.10.0
libtpu: 0.0.40
codegen_flags: <defaults>
</compile_context>

<pallas_src>
import numpy as np
import jax
import jax.numpy as jnp
from jax import lax
from jax.experimental import pallas as pl
from jax.experimental.pallas import tpu as pltpu


def layer_t3_kernel(xpad_ref, m1_ref, s_ref, m2_ref, pr_ref, pc_ref,
                    rs_ref, wr_ref, b1_ref, b2_ref, br_ref, out_ref):
    # xpad_ref : (1, H+2, (W+2)*Cin)  zero-padded input, channels merged in lanes
    # m1_ref   : (3, (W+2)*Cin, W*Cout)  conv1 block-Toeplitz (s1 folded)
    # s_ref    : (3, H, H)               conv2 row-shift (zero rows at borders)
    # m2_ref   : (3, W*Cout, W*Cout)     conv2 block-Toeplitz (s2 + col-pad folded)
    # pr_ref   : (Ho, H)                 pooling row-window sums
    # pc_ref   : (W*Cout, Wo*Cout)       pooling col-window sums (* 1/9 folded)
    # rs_ref   : (Ho, H+2)               residual row subsample selection
    # wr_ref   : ((W+2)*Cin, Wo*Cout)    residual col subsample + 1x1 conv (sr folded)
    # b1/b2/br : (1, W*Cout)/(1, W*Cout)/(1, Wo*Cout)  BN shifts, tiled over width
    _, Hp, _ = xpad_ref.shape
    H = Hp - 2
    WCout = m2_ref.shape[1]
    f32 = jnp.float32

    xp = xpad_ref[0]                                   # (H+2, (W+2)*Cin)

    # ---- conv1 (3x3, pad 1) + BN1 + ReLU -------------------------------------
    y1 = jnp.zeros((H, WCout), f32)
    for kh in range(3):
        y1 = y1 + jnp.dot(xp[kh:kh + H, :], m1_ref[kh],
                          preferred_element_type=f32)
    y1 = jnp.maximum(y1 + b1_ref[...], 0.0)            # (H, W*Cout)

    # ---- conv2 (3x3, pad 1) + BN2 --------------------------------------------
    y2 = jnp.zeros((H, WCout), f32)
    for kh in range(3):
        y2 = y2 + jnp.dot(
            jnp.dot(s_ref[kh], y1, preferred_element_type=f32),
            m2_ref[kh], preferred_element_type=f32)
    y2 = y2 + b2_ref[...]                               # (H, W*Cout)

    # ---- AvgPool2d(3, stride 2, pad 1, count_include_pad=True) ---------------
    pooled = jnp.dot(jnp.dot(pr_ref[...], y2, preferred_element_type=f32),
                     pc_ref[...], preferred_element_type=f32)   # (Ho, Wo*Cout)

    # ---- residual: 1x1 stride-2 conv + BN ------------------------------------
    res = jnp.dot(jnp.dot(rs_ref[...], xp, preferred_element_type=f32),
                  wr_ref[...], preferred_element_type=f32)      # (Ho, Wo*Cout)

    out_ref[0] = (pooled + res + br_ref[...]).astype(out_ref.dtype)


def _build_constants(p, H, W, Cin, Cout, Ho, Wo):
    """Fold BN scales, padding, pooling and striding into constant matrices."""
    w1f = np.asarray(p['w1'] * p['s1'], np.float32)            # (3,3,Cin,Cout)
    w2f = np.asarray(p['w2'] * p['s2'], np.float32)            # (3,3,Cout,Cout)
    wrf = np.asarray(p['wr'] * p['sr'][None, :], np.float32)   # (Cin,Cout)

    WCin_p = (W + 2) * Cin
    WCout = W * Cout
    WoCout = Wo * Cout

    M1 = np.zeros((3, WCin_p, WCout), np.float32)
    M2 = np.zeros((3, WCout, WCout), np.float32)
    for kh in range(3):
        for w in range(W):
            for kw in range(3):
                M1[kh, (w + kw) * Cin:(w + kw + 1) * Cin,
                   w * Cout:(w + 1) * Cout] = w1f[kh, kw]
                wp_ = w + kw - 1
                if 0 <= wp_ < W:                      # out-of-range = zero pad
                    M2[kh, wp_ * Cout:(wp_ + 1) * Cout,
                       w * Cout:(w + 1) * Cout] = w2f[kh, kw]

    S = np.zeros((3, H, H), np.float32)
    for kh in range(3):
        for h in range(H):
            hp_ = h + kh - 1
            if 0 <= hp_ < H:                          # out-of-range = zero row
                S[kh, h, hp_] = 1.0

    PR = (np.abs(np.arange(H)[None, :] - 2 * np.arange(Ho)[:, None]) <= 1
          ).astype(np.float32)                                     # (Ho, H)
    PC = np.zeros((WCout, WoCout), np.float32)
    eye9 = np.eye(Cout, dtype=np.float32) / 9.0       # count_include_pad: /9 always
    for j in range(Wo):
        for w in range(max(0, 2 * j - 1), min(W, 2 * j + 2)):
            PC[w * Cout:(w + 1) * Cout, j * Cout:(j + 1) * Cout] = eye9

    RS = np.zeros((Ho, H + 2), np.float32)            # pick padded row 2i+1 = x row 2i
    RS[np.arange(Ho), 2 * np.arange(Ho) + 1] = 1.0
    WR = np.zeros((WCin_p, WoCout), np.float32)       # pick padded col 2j+1 + 1x1 conv
    for j in range(Wo):
        WR[(2 * j + 1) * Cin:(2 * j + 2) * Cin,
           j * Cout:(j + 1) * Cout] = wrf

    b1t = np.tile(np.asarray(p['b1'], np.float32), W).reshape(1, WCout)
    b2t = np.tile(np.asarray(p['b2'], np.float32), W).reshape(1, WCout)
    brt = np.tile(np.asarray(p['br'], np.float32), Wo).reshape(1, WoCout)

    return (jnp.asarray(M1), jnp.asarray(S), jnp.asarray(M2), jnp.asarray(PR),
            jnp.asarray(PC), jnp.asarray(RS), jnp.asarray(WR),
            jnp.asarray(b1t), jnp.asarray(b2t), jnp.asarray(brt))


def layer_t3_pallas(x_nhwc, p):
    N, H, W, Cin = x_nhwc.shape
    Cout = p['w1'].shape[-1]
    Ho = (H + 2 - 3) // 2 + 1
    Wo = (W + 2 - 3) // 2 + 1
    WCin_p = (W + 2) * Cin
    WCout = W * Cout
    WoCout = Wo * Cout

    # planar, zero-padded input: (N, H+2, (W+2)*Cin) -- channels on lanes
    xpad2 = jnp.pad(x_nhwc, ((0, 0), (1, 1), (1, 1), (0, 0))
                    ).reshape(N, H + 2, WCin_p)

    M1, S, M2, PR, PC, RS, WR, b1t, b2t, brt = _build_constants(
        p, H, W, Cin, Cout, Ho, Wo)

    def full(shape):
        return pl.BlockSpec(shape, lambda n, _r=len(shape): (0,) * _r)

    out = pl.pallas_call(
        layer_t3_kernel,
        out_shape=jax.ShapeDtypeStruct((N, Ho, WoCout), jnp.float32),
        grid=(N,),
        in_specs=[
            pl.BlockSpec((1, H + 2, WCin_p), lambda n: (n, 0, 0)),
            full((3, WCin_p, WCout)),
            full((3, H, H)),
            full((3, WCout, WCout)),
            full((Ho, H)),
            full((WCout, WoCout)),
            full((Ho, H + 2)),
            full((WCin_p, WoCout)),
            full((1, WCout)),
            full((1, WCout)),
            full((1, WoCout)),
        ],
        out_specs=pl.BlockSpec((1, Ho, WoCout), lambda n: (n, 0, 0)),
        compiler_params=pltpu.CompilerParams(
            dimension_semantics=("parallel",)),      # batch images independent
    )(xpad2, M1, S, M2, PR, PC, RS, WR, b1t, b2t, brt)

    # TODO(synk): for much larger H/W/C, tile over output rows (halo BlockSpec)
    # and set vmem_limit_bytes explicitly (v7x has only 64 MiB VMEM).
    return out.reshape(N, Ho, Wo, Cout)


def init_params(key, cin, cout):
    """Deterministic synthetic weights; BN folded to scale/shift (eval mode)."""
    ks = jax.random.split(key, 15)

    def bn(kk):
        g = 1.0 + 0.1 * jax.random.normal(kk[0], (cout,), jnp.float32)
        b = 0.1 * jax.random.normal(kk[1], (cout,), jnp.float32)
        m = 0.1 * jax.random.normal(kk[2], (cout,), jnp.float32)
        v = jax.random.uniform(kk[3], (cout,), jnp.float32, 0.5, 1.5)
        scale = g * lax.rsqrt(v + 1e-5)
        shift = b - m * scale
        return scale, shift

    w1 = 0.3 * jax.random.normal(ks[0], (3, 3, cin, cout), jnp.float32)
    w2 = 0.2 * jax.random.normal(ks[1], (3, 3, cout, cout), jnp.float32)
    wr = 0.3 * jax.random.normal(ks[2], (cin, cout), jnp.float32)
    s1, b1 = bn(ks[3:7])
    s2, b2 = bn(ks[7:11])
    sr, br = bn(ks[11:15])
    return dict(w1=w1, w2=w2, wr=wr, s1=s1, b1=b1, s2=s2, b2=b2, sr=sr, br=br)


def layer_t3_ref(x, p):
    """Pure-JAX reference (same semantics as the PyTorch module in eval mode)."""
    dn1 = lax.conv_dimension_numbers(x.shape, p['w1'].shape, ('NHWC', 'HWIO', 'NHWC'))
    y1 = lax.conv_general_dilated(x, p['w1'], (1, 1), ((1, 1), (1, 1)),
                                  dimension_numbers=dn1)
    y1 = jnp.maximum(y1 * p['s1'] + p['b1'], 0.0)
    dn2 = lax.conv_dimension_numbers(y1.shape, p['w2'].shape, ('NHWC', 'HWIO', 'NHWC'))
    y2 = lax.conv_general_dilated(y1, p['w2'], (1, 1), ((1, 1), (1, 1)),
                                  dimension_numbers=dn2)
    y2 = y2 * p['s2'] + p['b2']
    y2p = jnp.pad(y2, ((0, 0), (1, 1), (1, 1), (0, 0)))
    pooled = lax.reduce_window(y2p, 0.0, lax.add,
                               (1, 3, 3, 1), (1, 2, 2, 1), 'VALID') / 9.0
    Ho, Wo = pooled.shape[1], pooled.shape[2]
    xs = x[:, ::2, ::2, :][:, :Ho, :Wo, :]
    res = jnp.einsum('nhwc,cd->nhwd', xs, p['wr']) * p['sr'] + p['br']
    return pooled + res


if __name__ == "__main__":
    key = jax.random.PRNGKey(0)
    kx, kp = jax.random.split(key)

    N, Cin, Cout, H, W = 2, 4, 8, 16, 16
    x_nchw = jax.random.normal(kx, (N, Cin, H, W), jnp.float32)   # PyTorch layout
    x = jnp.transpose(x_nchw, (0, 2, 3, 1))                       # NHWC for kernel
    params = init_params(kp, Cin, Cout)

    out = jax.block_until_ready(layer_t3_pallas(x, params))
    ref = jax.block_until_ready(layer_t3_ref(x, params))

    Ho = (H - 1) // 2 + 1
    Wo = (W - 1) // 2 + 1
    assert out.shape == (N, Ho, Wo, Cout), out.shape

    if np.allclose(np.asarray(out), np.asarray(ref), rtol=3e-2, atol=3e-2):
        print("KERNEL_OK")
    else:
        err = float(np.max(np.abs(np.asarray(out) - np.asarray(ref))))
        print(f"MISMATCH max_abs_err={err}")
</pallas_src>

<mosaic_0001>
module attributes {stable_mosaic.version = 11 : i64} {
  func.func @layer_t3_kernel(%arg0: i32, %arg1: memref<1x18x72xf32, #tpu.memory_space<vmem>>, %arg2: memref<3x72x128xf32, #tpu.memory_space<vmem>>, %arg3: memref<3x16x16xf32, #tpu.memory_space<vmem>>, %arg4: memref<3x128x128xf32, #tpu.memory_space<vmem>>, %arg5: memref<8x16xf32, #tpu.memory_space<vmem>>, %arg6: memref<128x64xf32, #tpu.memory_space<vmem>>, %arg7: memref<8x18xf32, #tpu.memory_space<vmem>>, %arg8: memref<72x64xf32, #tpu.memory_space<vmem>>, %arg9: memref<1x128xf32, #tpu.memory_space<vmem>>, %arg10: memref<1x128xf32, #tpu.memory_space<vmem>>, %arg11: memref<1x64xf32, #tpu.memory_space<vmem>>, %arg12: memref<1x8x64xf32, #tpu.memory_space<vmem>>) attributes {dimension_semantics = [#tpu.dimension_semantics<parallel>], iteration_bounds = array<i64: 2>, scalar_prefetch = 0 : i64, scratch_operands = 0 : i64, tpu.core_type = #tpu.core_type<tc>, window_params = [{transform_indices = @transform_0, window_bounds = array<i64: 1, 18, 72>}, {pipeline_mode = #tpu.pipeline_mode<synchronous>, transform_indices = @transform_1, window_bounds = array<i64: 3, 72, 128>}, {pipeline_mode = #tpu.pipeline_mode<synchronous>, transform_indices = @transform_2, window_bounds = array<i64: 3, 16, 16>}, {pipeline_mode = #tpu.pipeline_mode<synchronous>, transform_indices = @transform_3, window_bounds = array<i64: 3, 128, 128>}, {pipeline_mode = #tpu.pipeline_mode<synchronous>, transform_indices = @transform_4, window_bounds = array<i64: 8, 16>}, {pipeline_mode = #tpu.pipeline_mode<synchronous>, transform_indices = @transform_5, window_bounds = array<i64: 128, 64>}, {pipeline_mode = #tpu.pipeline_mode<synchronous>, transform_indices = @transform_6, window_bounds = array<i64: 8, 18>}, {pipeline_mode = #tpu.pipeline_mode<synchronous>, transform_indices = @transform_7, window_bounds = array<i64: 72, 64>}, {pipeline_mode = #tpu.pipeline_mode<synchronous>, transform_indices = @transform_8, window_bounds = array<i64: 1, 128>}, {pipeline_mode = #tpu.pipeline_mode<synchronous>, transform_indices = @transform_9, window_bounds = array<i64: 1, 128>}, {pipeline_mode = #tpu.pipeline_mode<synchronous>, transform_indices = @transform_10, window_bounds = array<i64: 1, 64>}, {transform_indices = @transform_11, window_bounds = array<i64: 1, 8, 64>}]} {
    %c0 = arith.constant 0 : index
    %c0_0 = arith.constant 0 : index
    %c0_1 = arith.constant 0 : index
    %0 = vector.load %arg1[%c0, %c0_0, %c0_1] : memref<1x18x72xf32, #tpu.memory_space<vmem>>, vector<1x18x72xf32>
    %1 = vector.shape_cast %0 : vector<1x18x72xf32> to vector<18x72xf32>
    %cst = arith.constant 0.000000e+00 : f32
    %2 = vector.broadcast %cst : f32 to vector<16x128xf32>
    %3 = vector.extract_strided_slice %1 {offsets = [0, 0], sizes = [16, 72], strides = [1, 1]} : vector<18x72xf32> to vector<16x72xf32>
    %c0_2 = arith.constant 0 : index
    %c0_3 = arith.constant 0 : index
    %c0_4 = arith.constant 0 : index
    %4 = vector.load %arg2[%c0_2, %c0_3, %c0_4] : memref<3x72x128xf32, #tpu.memory_space<vmem>>, vector<1x72x128xf32>
    %5 = vector.shape_cast %4 : vector<1x72x128xf32> to vector<72x128xf32>
    %cst_5 = arith.constant dense<0.000000e+00> : vector<16x128xf32>
    %6 = tpu.matmul %3, %5, %cst_5 {dimension_numbers = #tpu.dot_dimension_numbers<[1], [0], [0], [1], [0, 0, 1, 1], [], []>} : vector<16x72xf32>, vector<72x128xf32>, vector<16x128xf32> -> vector<16x128xf32>
    %7 = arith.addf %2, %6 : vector<16x128xf32>
    %8 = vector.extract_strided_slice %1 {offsets = [1, 0], sizes = [16, 72], strides = [1, 1]} : vector<18x72xf32> to vector<16x72xf32>
    %c1 = arith.constant 1 : index
    %c0_6 = arith.constant 0 : index
    %c0_7 = arith.constant 0 : index
    %9 = vector.load %arg2[%c1, %c0_6, %c0_7] : memref<3x72x128xf32, #tpu.memory_space<vmem>>, vector<1x72x128xf32>
    %10 = vector.shape_cast %9 : vector<1x72x128xf32> to vector<72x128xf32>
    %cst_8 = arith.constant dense<0.000000e+00> : vector<16x128xf32>
    %11 = tpu.matmul %8, %10, %cst_8 {dimension_numbers = #tpu.dot_dimension_numbers<[1], [0], [0], [1], [0, 0, 1, 1], [], []>} : vector<16x72xf32>, vector<72x128xf32>, vector<16x128xf32> -> vector<16x128xf32>
    %12 = arith.addf %7, %11 : vector<16x128xf32>
    %13 = vector.extract_strided_slice %1 {offsets = [2, 0], sizes = [16, 72], strides = [1, 1]} : vector<18x72xf32> to vector<16x72xf32>
    %c2 = arith.constant 2 : index
    %c0_9 = arith.constant 0 : index
    %c0_10 = arith.constant 0 : index
    %14 = vector.load %arg2[%c2, %c0_9, %c0_10] : memref<3x72x128xf32, #tpu.memory_space<vmem>>, vector<1x72x128xf32>
    %15 = vector.shape_cast %14 : vector<1x72x128xf32> to vector<72x128xf32>
    %cst_11 = arith.constant dense<0.000000e+00> : vector<16x128xf32>
    %16 = tpu.matmul %13, %15, %cst_11 {dimension_numbers = #tpu.dot_dimension_numbers<[1], [0], [0], [1], [0, 0, 1, 1], [], []>} : vector<16x72xf32>, vector<72x128xf32>, vector<16x128xf32> -> vector<16x128xf32>
    %17 = arith.addf %12, %16 : vector<16x128xf32>
    %c0_12 = arith.constant 0 : index
    %c0_13 = arith.constant 0 : index
    %18 = vector.load %arg9[%c0_12, %c0_13] : memref<1x128xf32, #tpu.memory_space<vmem>>, vector<1x128xf32>
    %19 = vector.broadcast %18 : vector<1x128xf32> to vector<16x128xf32>
    %20 = arith.addf %17, %19 : vector<16x128xf32>
    %cst_14 = arith.constant 0.000000e+00 : f32
    %21 = vector.broadcast %cst_14 : f32 to vector<16x128xf32>
    %22 = arith.maximumf %20, %21 : vector<16x128xf32>
    %cst_15 = arith.constant 0.000000e+00 : f32
    %23 = vector.broadcast %cst_15 : f32 to vector<16x128xf32>
    %c0_16 = arith.constant 0 : index
    %c0_17 = arith.constant 0 : index
    %c0_18 = arith.constant 0 : index
    %24 = vector.load %arg3[%c0_16, %c0_17, %c0_18] : memref<3x16x16xf32, #tpu.memory_space<vmem>>, vector<1x16x16xf32>
    %25 = vector.shape_cast %24 : vector<1x16x16xf32> to vector<16x16xf32>
    %cst_19 = arith.constant dense<0.000000e+00> : vector<16x128xf32>
    %26 = tpu.matmul %25, %22, %cst_19 {dimension_numbers = #tpu.dot_dimension_numbers<[1], [0], [0], [1], [0, 0, 1, 1], [], []>} : vector<16x16xf32>, vector<16x128xf32>, vector<16x128xf32> -> vector<16x128xf32>
    %c0_20 = arith.constant 0 : index
    %c0_21 = arith.constant 0 : index
    %c0_22 = arith.constant 0 : index
    %27 = vector.load %arg4[%c0_20, %c0_21, %c0_22] : memref<3x128x128xf32, #tpu.memory_space<vmem>>, vector<1x128x128xf32>
    %28 = vector.shape_cast %27 : vector<1x128x128xf32> to vector<128x128xf32>
    %cst_23 = arith.constant dense<0.000000e+00> : vector<16x128xf32>
    %29 = tpu.matmul %26, %28, %cst_23 {dimension_numbers = #tpu.dot_dimension_numbers<[1], [0], [0], [1], [0, 0, 1, 1], [], []>} : vector<16x128xf32>, vector<128x128xf32>, vector<16x128xf32> -> vector<16x128xf32>
    %30 = arith.addf %23, %29 : vector<16x128xf32>
    %c1_24 = arith.constant 1 : index
    %c0_25 = arith.constant 0 : index
    %c0_26 = arith.constant 0 : index
    %31 = vector.load %arg3[%c1_24, %c0_25, %c0_26] : memref<3x16x16xf32, #tpu.memory_space<vmem>>, vector<1x16x16xf32>
    %32 = vector.shape_cast %31 : vector<1x16x16xf32> to vector<16x16xf32>
    %cst_27 = arith.constant dense<0.000000e+00> : vector<16x128xf32>
    %33 = tpu.matmul %32, %22, %cst_27 {dimension_numbers = #tpu.dot_dimension_numbers<[1], [0], [0], [1], [0, 0, 1, 1], [], []>} : vector<16x16xf32>, vector<16x128xf32>, vector<16x128xf32> -> vector<16x128xf32>
    %c1_28 = arith.constant 1 : index
    %c0_29 = arith.constant 0 : index
    %c0_30 = arith.constant 0 : index
    %34 = vector.load %arg4[%c1_28, %c0_29, %c0_30] : memref<3x128x128xf32, #tpu.memory_space<vmem>>, vector<1x128x128xf32>
    %35 = vector.shape_cast %34 : vector<1x128x128xf32> to vector<128x128xf32>
    %cst_31 = arith.constant dense<0.000000e+00> : vector<16x128xf32>
    %36 = tpu.matmul %33, %35, %cst_31 {dimension_numbers = #tpu.dot_dimension_numbers<[1], [0], [0], [1], [0, 0, 1, 1], [], []>} : vector<16x128xf32>, vector<128x128xf32>, vector<16x128xf32> -> vector<16x128xf32>
    %37 = arith.addf %30, %36 : vector<16x128xf32>
    %c2_32 = arith.constant 2 : index
    %c0_33 = arith.constant 0 : index
    %c0_34 = arith.constant 0 : index
    %38 = vector.load %arg3[%c2_32, %c0_33, %c0_34] : memref<3x16x16xf32, #tpu.memory_space<vmem>>, vector<1x16x16xf32>
    %39 = vector.shape_cast %38 : vector<1x16x16xf32> to vector<16x16xf32>
    %cst_35 = arith.constant dense<0.000000e+00> : vector<16x128xf32>
    %40 = tpu.matmul %39, %22, %cst_35 {dimension_numbers = #tpu.dot_dimension_numbers<[1], [0], [0], [1], [0, 0, 1, 1], [], []>} : vector<16x16xf32>, vector<16x128xf32>, vector<16x128xf32> -> vector<16x128xf32>
    %c2_36 = arith.constant 2 : index
    %c0_37 = arith.constant 0 : index
    %c0_38 = arith.constant 0 : index
    %41 = vector.load %arg4[%c2_36, %c0_37, %c0_38] : memref<3x128x128xf32, #tpu.memory_space<vmem>>, vector<1x128x128xf32>
    %42 = vector.shape_cast %41 : vector<1x128x128xf32> to vector<128x128xf32>
    %cst_39 = arith.constant dense<0.000000e+00> : vector<16x128xf32>
    %43 = tpu.matmul %40, %42, %cst_39 {dimension_numbers = #tpu.dot_dimension_numbers<[1], [0], [0], [1], [0, 0, 1, 1], [], []>} : vector<16x128xf32>, vector<128x128xf32>, vector<16x128xf32> -> vector<16x128xf32>
    %44 = arith.addf %37, %43 : vector<16x128xf32>
    %c0_40 = arith.constant 0 : index
    %c0_41 = arith.constant 0 : index
    %45 = vector.load %arg10[%c0_40, %c0_41] : memref<1x128xf32, #tpu.memory_space<vmem>>, vector<1x128xf32>
    %46 = vector.broadcast %45 : vector<1x128xf32> to vector<16x128xf32>
    %47 = arith.addf %44, %46 : vector<16x128xf32>
    %c0_42 = arith.constant 0 : index
    %c0_43 = arith.constant 0 : index
    %48 = vector.load %arg5[%c0_42, %c0_43] : memref<8x16xf32, #tpu.memory_space<vmem>>, vector<8x16xf32>
    %cst_44 = arith.constant dense<0.000000e+00> : vector<8x128xf32>
    %49 = tpu.matmul %48, %47, %cst_44 {dimension_numbers = #tpu.dot_dimension_numbers<[1], [0], [0], [1], [0, 0, 1, 1], [], []>} : vector<8x16xf32>, vector<16x128xf32>, vector<8x128xf32> -> vector<8x128xf32>
    %c0_45 = arith.constant 0 : index
    %c0_46 = arith.constant 0 : index
    %50 = vector.load %arg6[%c0_45, %c0_46] : memref<128x64xf32, #tpu.memory_space<vmem>>, vector<128x64xf32>
    %cst_47 = arith.constant dense<0.000000e+00> : vector<8x64xf32>
    %51 = tpu.matmul %49, %50, %cst_47 {dimension_numbers = #tpu.dot_dimension_numbers<[1], [0], [0], [1], [0, 0, 1, 1], [], []>} : vector<8x128xf32>, vector<128x64xf32>, vector<8x64xf32> -> vector<8x64xf32>
    %c0_48 = arith.constant 0 : index
    %c0_49 = arith.constant 0 : index
    %52 = vector.load %arg7[%c0_48, %c0_49] : memref<8x18xf32, #tpu.memory_space<vmem>>, vector<8x18xf32>
    %cst_50 = arith.constant dense<0.000000e+00> : vector<8x72xf32>
    %53 = tpu.matmul %52, %1, %cst_50 {dimension_numbers = #tpu.dot_dimension_numbers<[1], [0], [0], [1], [0, 0, 1, 1], [], []>} : vector<8x18xf32>, vector<18x72xf32>, vector<8x72xf32> -> vector<8x72xf32>
    %c0_51 = arith.constant 0 : index
    %c0_52 = arith.constant 0 : index
    %54 = vector.load %arg8[%c0_51, %c0_52] : memref<72x64xf32, #tpu.memory_space<vmem>>, vector<72x64xf32>
    %cst_53 = arith.constant dense<0.000000e+00> : vector<8x64xf32>
    %55 = tpu.matmul %53, %54, %cst_53 {dimension_numbers = #tpu.dot_dimension_numbers<[1], [0], [0], [1], [0, 0, 1, 1], [], []>} : vector<8x72xf32>, vector<72x64xf32>, vector<8x64xf32> -> vector<8x64xf32>
    %56 = arith.addf %51, %55 : vector<8x64xf32>
    %c0_54 = arith.constant 0 : index
    %c0_55 = arith.constant 0 : index
    %57 = vector.load %arg11[%c0_54, %c0_55] : memref<1x64xf32, #tpu.memory_space<vmem>>, vector<1x64xf32>
    %58 = vector.broadcast %57 : vector<1x64xf32> to vector<8x64xf32>
    %59 = arith.addf %56, %58 : vector<8x64xf32>
    %c0_56 = arith.constant 0 : index
    %c0_57 = arith.constant 0 : index
    %c0_58 = arith.constant 0 : index
    %60 = vector.load %arg12[%c0_56, %c0_57, %c0_58] : memref<1x8x64xf32, #tpu.memory_space<vmem>>, vector<1x8x64xf32>
    %61 = vector.shape_cast %60 : vector<1x8x64xf32> to vector<8x64xf32>
    %62 = vector.shape_cast %59 : vector<8x64xf32> to vector<1x8x64xf32>
    tpu.vector_store %arg12[%c0_56, %c0_57, %c0_58], %62 {strides = array<i32>} : memref<1x8x64xf32, #tpu.memory_space<vmem>>, vector<1x8x64xf32>,
    return
  }
  func.func @transform_0(%arg0: i32) -> (i32, i32, i32) {
    %c0_i32 = arith.constant 0 : i32
    %c0_i32_0 = arith.constant 0 : i32
    %c0_i32_1 = arith.constant 0 : i32
    return %arg0, %c0_i32, %c0_i32_0 : i32, i32, i32
  }
  func.func @transform_1(%arg0: i32) -> (i32, i32, i32) {
    %c0_i32 = arith.constant 0 : i32
    %c0_i32_0 = arith.constant 0 : i32
    %c0_i32_1 = arith.constant 0 : i32
    %c0_i32_2 = arith.constant 0 : i32
    return %c0_i32, %c0_i32_0, %c0_i32_1 : i32, i32, i32
  }
  func.func @transform_2(%arg0: i32) -> (i32, i32, i32) {
    %c0_i32 = arith.constant 0 : i32
    %c0_i32_0 = arith.constant 0 : i32
    %c0_i32_1 = arith.constant 0 : i32
    %c0_i32_2 = arith.constant 0 : i32
    return %c0_i32, %c0_i32_0, %c0_i32_1 : i32, i32, i32
  }
  func.func @transform_3(%arg0: i32) -> (i32, i32, i32) {
    %c0_i32 = arith.constant 0 : i32
    %c0_i32_0 = arith.constant 0 : i32
    %c0_i32_1 = arith.constant 0 : i32
    %c0_i32_2 = arith.constant 0 : i32
    return %c0_i32, %c0_i32_0, %c0_i32_1 : i32, i32, i32
  }
  func.func @transform_4(%arg0: i32) -> (i32, i32) {
    %c0_i32 = arith.constant 0 : i32
    %c0_i32_0 = arith.constant 0 : i32
    %c0_i32_1 = arith.constant 0 : i32
    return %c0_i32, %c0_i32_0 : i32, i32
  }
  func.func @transform_5(%arg0: i32) -> (i32, i32) {
    %c0_i32 = arith.constant 0 : i32
    %c0_i32_0 = arith.constant 0 : i32
    %c0_i32_1 = arith.constant 0 : i32
    return %c0_i32, %c0_i32_0 : i32, i32
  }
  func.func @transform_6(%arg0: i32) -> (i32, i32) {
    %c0_i32 = arith.constant 0 : i32
    %c0_i32_0 = arith.constant 0 : i32
    %c0_i32_1 = arith.constant 0 : i32
    return %c0_i32, %c0_i32_0 : i32, i32
  }
  func.func @transform_7(%arg0: i32) -> (i32, i32) {
    %c0_i32 = arith.constant 0 : i32
    %c0_i32_0 = arith.constant 0 : i32
    %c0_i32_1 = arith.constant 0 : i32
    return %c0_i32, %c0_i32_0 : i32, i32
  }
  func.func @transform_8(%arg0: i32) -> (i32, i32) {
    %c0_i32 = arith.constant 0 : i32
    %c0_i32_0 = arith.constant 0 : i32
    %c0_i32_1 = arith.constant 0 : i32
    return %c0_i32, %c0_i32_0 : i32, i32
  }
  func.func @transform_9(%arg0: i32) -> (i32, i32) {
    %c0_i32 = arith.constant 0 : i32
    %c0_i32_0 = arith.constant 0 : i32
    %c0_i32_1 = arith.constant 0 : i32
    return %c0_i32, %c0_i32_0 : i32, i32
  }
  func.func @transform_10(%arg0: i32) -> (i32, i32) {
    %c0_i32 = arith.constant 0 : i32
    %c0_i32_0 = arith.constant 0 : i32
    %c0_i32_1 = arith.constant 0 : i32
    return %c0_i32, %c0_i32_0 : i32, i32
  }
  func.func @transform_11(%arg0: i32) -> (i32, i32, i32) {
    %c0_i32 = arith.constant 0 : i32
    %c0_i32_0 = arith.constant 0 : i32
    %c0_i32_1 = arith.constant 0 : i32
    return %arg0, %c0_i32, %c0_i32_0 : i32, i32, i32
  }
}

</mosaic_0001>

<bundles_post_ra>
// kernel: tpu_custom_call.1
= control target key start
LH: loop header
LB: loop body
LE: loop exit
PB: predicated region body
PF: predicated region fallthrough
CT: control target
= control target key end

     0   :  { %16 = vsyncpa [#allocation3], 0  ;;  %s3071_s0 = inlined_call_operand.vmem [shape: f32[2,18,72], index: 0, kind: input, shape index: {}]   ;;  %s3072_s1 = inlined_call_operand.hbm [shape: f32[3,72,128], index: 1, kind: input, shape index: {}]   ;;  %s3073_s2 = inlined_call_operand.hbm [shape: f32[3,16,16], index: 2, kind: input, shape index: {}]   ;;  %s3074_s3 = inlined_call_operand.vmem [shape: f32[3,128,128], index: 3, kind: input, shape index: {}]   ;;  %s3075_s4 = inlined_call_operand.vmem [shape: f32[8,16], index: 4, kind: input, shape index: {}]   ;;  %s3076_s5 = inlined_call_operand.vmem [shape: f32[128,64], index: 5, kind: input, shape index: {}]   ;;  %s3077_s6 = inlined_call_operand.vmem [shape: f32[8,18], index: 6, kind: input, shape index: {}]   ;;  %s3078_s7 = inlined_call_operand.vmem [shape: f32[72,64], index: 7, kind: input, shape index: {}]   ;;  %s3079_s8 = inlined_call_operand.vmem [shape: f32[1,128], index: 8, kind: input, shape index: {}]   ;;  %s3080_s9 = inlined_call_operand.vmem [shape: f32[1,128], index: 9, kind: input, shape index: {}]   ;;  %s3081_s10 = inlined_call_operand.vmem [shape: f32[1,64], index: 10, kind: input, shape index: {}]   ;;  %s3082_s11 = inlined_call_operand.hbm [shape: f32[2,8,64], index: 11, kind: output, shape index: {}]  }
   0x1   :  { %17 = vsyncpa [#allocation6], 0 }
   0x2   :  { %18 = vsyncpa [#allocation4], 0 }
   0x3   :  { %20 = vsyncpa [#allocation4 + $0x1], 0  ;;  %s2603_s17 = smov 0   ;;  %s2605_s18 = smov 0  }
   0x4   :  { %s2607_s19 = smov 0   ;;  %s2609_s20 = smov 0  }
   0x5 LB: > { %3091 = sst [smem:[#allocation11_spill]] %s2521_s17  ;;  %s2624_s21 = sadd.s32 4294967295, %s2533_s20   ;;  %s2533_s20 = sphi %s2609_s20, %s3109_s20   ;;  %s2529_s19 = sphi %s2607_s19, %s3111_s19   ;;  %s2525_s18 = sphi %s2605_s18, %s3113_s18   ;;  %s2521_s17 = sphi %s2603_s17, %s3112_s17  }
   0x6   : > { %3092 = sst [smem:[#allocation12_spill]] %s2529_s19  ;;  %s1676_s22 = sadd.s32 4294967294, %s2533_s20  }
   0x7   : > { %s2628_s23 = sadd.s32 1, %s2533_s20   ;;  %s269_s24 = sadd.s32 1, %s2529_s19 }
   0x8   : > { %3093 = sst [smem:[#allocation13_spill]] %s2628_s23  ;;  %s266_s25 = ssub.s32 %s2533_s20, %s2628_s23 }
   0x9   : > { %p279_p0 = scmp.ne.s32.totalorder %s2529_s19, %s2525_s18  ;;  %p267_p1 = scmp.eq.s32.totalorder %s266_s25, 0 }
   0xa   : > { %p280_p2 = scmp.eq.s32.totalorder %s2624_s21, 1  ;;  %p285_p3 = scmp.ne.s32.totalorder %s2525_s18, %s2521_s17 }
   0xb   : > { %p286_p4 = scmp.eq.s32.totalorder %s1676_s22, 1  ;;  %p1677_p7 = scmp.ge.s32.totalorder %s2533_s20, 1 }
   0xc   : > { %s2639_s26 = scalar_select %p267_p1, %s2529_s19, %s269_s24  }
   0xd   : > { %p2641_p5 = por %p280_p2, %p279_p0  ;;  %p2645_p6 = por %p286_p4, %p285_p3 }
   0xe   : > { %3094 = sst [smem:[#allocation14_spill]] %s2639_s26  ;;  %p293_p8 = scmp.lt.s32.totalorder %s2533_s20, 3 }
   0xf   : > { %s3095_s27 = scalar_select %p2641_p5, 1, 0 }
  0x10   : > { %s3096_s28 = scalar_select %p2645_p6, 1, 0 }
  0x11   : > { %p3084_p9 = scmp.eq.s32.totalorder %s2624_s21, 0  ;;  %p2652_p10 = pnand %p1677_p7, %p293_p8 }
  0x12   : > { %3097 = sst [smem:[#allocation15_spill]] %s3096_s28  ;;  %s2535_s30 = smov [#allocation2]  }
  0x13   : > { %s3098_s29 = scalar_select %p2652_p10, 1, 0 }
  0x14   : > { %s305_s12 = sshll.u32 %s2535_s30, 4  ;;  %p2352_p11 = pneg %p2652_p10  ;;  %s306_s12 = int_to_ptr.vmem [resolvable:$true] %s305_s12 }
  0x15   : > { %s2536_s14 = smov [#allocation5]   ;;  %s2407_s24 = scalar_lea.hbm %s3072_s1, 3456 }
  0x16   : > { %p2660_p12 = pnand %p3084_p9, %p2352_p11  ;;  %s318_s15 = sshll.u32 %s2536_s14, 4  ;;  %s2664_s15 = int_to_ptr.vmem [resolvable:$true] %s318_s15 }
  0x17   : > { %p2408_p13 = scmp.ne.s32.totalorder %s3072_s1, %s2407_s24  ;;  %p2414_p3 = scmp.lt.u32.totalorder %s2407_s24, %s3072_s1 }
  0x18   : > { %p2409_p0 = pneg %p2660_p12 }
  0x1a   : > { %p2410_p1 = pnand %p2409_p0, %p2408_p13 }
  0x1c   : > { %p2411_p2 = pneg %p2410_p1 }
  0x1e   : > { %p2416_p4 = pnand %p2414_p3, %p2411_p2 }
  0x20   : > { %2419 = shalt.err (!%p2416_p4)
}
  0x21   : > { %s2420_s14 = scalar_lea.vmem %s306_s12, 3456  ;;  %p2428_p9 = scmp.lt.s32.totalorder %s306_s12, %s306_s12 }
  0x22   : > { %p2421_p7 = scmp.ne.s32.totalorder %s306_s12, %s2420_s14  ;;  %p2429_p6 = scmp.lt.s32.totalorder %s2420_s14, %s2420_s14 }
  0x24   : > { %p2423_p8 = pnand %p2421_p7, %p2409_p0  ;;  %p2430_p5 = por %p2429_p6, %p2428_p9 }
  0x26   : > { %p2424_p11 = pneg %p2423_p8 }
  0x28   : > { %p2431_p10 = pnand %p2430_p5, %p2424_p11 }
  0x2a   : > { %2434 = shalt.err (!%p2431_p10)
}
  0x2b   : > { %s2537_s16 = smov 128   ;;  %s2538_s22 = smov 8  }
  0x2c   : > { %2355 = dma.hbm_to_vmem [thread:$0]  (!%p2660_p12), %s3072_s1, 3456, %s306_s12, [#allocation3], %s2537_s16, %s2537_s16, %s2538_s22  }
  0x2d   : > { %s2435_s30 = scalar_lea.hbm %s3073_s2, 768 }
  0x2e   : > { %p2436_p13 = scmp.ne.s32.totalorder %s3073_s2, %s2435_s30  ;;  %p2442_p9 = scmp.lt.u32.totalorder %s2435_s30, %s3073_s2 }
  0x30   : > { %p2438_p5 = pnand %p2436_p13, %p2409_p0 }
  0x32   : > { %p2439_p6 = pneg %p2438_p5 }
  0x34   : > { %p2444_p10 = pnand %p2442_p9, %p2439_p6 }
  0x36   : > { %2447 = shalt.err (!%p2444_p10)
}
  0x37   : > { %s2448_s12 = scalar_lea.vmem %s2664_s15, 768  ;;  %p2456_p4 = scmp.lt.s32.totalorder %s2664_s15, %s2664_s15 }
  0x38   : > { %p2449_p1 = scmp.ne.s32.totalorder %s2664_s15, %s2448_s12  ;;  %p2457_p7 = scmp.lt.s32.totalorder %s2448_s12, %s2448_s12 }
  0x3a   : > { %p2451_p2 = pnand %p2449_p1, %p2409_p0  ;;  %p2458_p8 = por %p2457_p7, %p2456_p4 }
  0x3c   : > { %p2452_p3 = pneg %p2451_p2 }
  0x3e   : > { %p2459_p11 = pnand %p2458_p8, %p2452_p3 }
  0x40   : > { %2462 = shalt.err (!%p2459_p11)
}
  0x41   : > { %2358 = dma.hbm_to_vmem [thread:$0]  (!%p2660_p12), %s3073_s2, 768, %s2664_s15, [#allocation6], %s2537_s16, %s2537_s16, %s2538_s22  }
  0x42   : > { %p3100_p13 = scmp.ne.s32.totalorder %s3098_s29, 0 }
  0x43   : > { %p3101_p5 = scmp.eq.s32.totalorder (!%p3100_p13), %s2624_s21, 0 }
  0x44   : > { %366 = sbr.rel (%p3100_p13) target bundleno = 1304 (0x518), region = 64 }
  0x4b   : > { %2508 = dma.done.wait (%p3101_p5), [#allocation3], 3456   ;;  %p3102_p0 = pmov %p3101_p5 }
  0x4d   : > { %2510 = vsyncadd (%p3102_p0), [#allocation3], 4294963840  ;;  %p3103_p6 = pmov %p3102_p0 }
  0x4e   : > { %p3104_p9 = pmov %p3102_p0 }
  0x4f   : > { %2512 = dma.done.wait (%p3103_p6), [#allocation6], 768  }
  0x50   : > { %2514 = vsyncadd (%p3104_p9), [#allocation6], 4294966528  ;;  %p410_p10 = scmp.lt.s32.totalorder %s2624_s21, 1  ;;  %v428_v0 = vld [vmem:[#allocation2 + $0x48] sm:$0xff]  ;;  %v429_v1 = vld [vmem:[#allocation2 + $0x50] sm:$0xff]  ;;  %vm440_vm0 = vcmask 1046528  }
  0x51   : > { %v430_v2 = vld [vmem:[#allocation2 + $0x58] sm:$0xff]  ;;  %v2135_v3 = vpack.c.bf16 %v429_v1, %v428_v0  ;;  %v431_v4 = vld [vmem:[#allocation2 + $0x60] sm:$0xff]  ;;  %v432_v6 = vld [vmem:[#allocation2 + $0x68] sm:$0xff]  ;;  %vm446_vm1 = vcmask 588800   ;;  %vm615_vm2 = vcmask 1045504   ;;  %vm715_vm3 = vcmask 130048  }
  0x52   : > { %s411_s28 = scalar_select %p410_p10, %s2624_s21, 1  ;;  %v2139_v5 = vpack.c.bf16 %v431_v4, %v430_v2  ;;  %v433_v7 = vld [vmem:[#allocation2 + $0x70] sm:$0xff]  ;;  %v434_v13 = vld [vmem:[#allocation2 + $0x78] sm:$0xff]  ;;  %v435_v14 = vld [vmem:[#allocation2 + $0x80] sm:$0xff]  ;;  %vm2540_vm4 = vmmov 0   ;;  %vm1346_vm5 = vcmask 1041408  }
  0x53   : > { %2136 = vmatprep.subr.bf16.mxu0 %v2135_v3  ;;  %v2143_v12 = vpack.c.bf16 %v433_v7, %v432_v6  ;;  %v2147_v16 = vpack.c.bf16 %v435_v14, %v434_v13  ;;  %v436_v18 = vld [vmem:[#allocation2 + $0x88] sm:$0xff]  ;;  %v418_v19 = vld [vmem:[#allocation2] sm:$0xff]  ;;  %v420_v22 = vld [vmem:[#allocation2 + $0x10] sm:$0xff]  ;;  %vm1342_vm6 = vcmask 146432   ;;  %s407_s25 = sand.u32 1, %s2525_s18   ;;  %s1738_s17 = sshll.u32 %s2624_s21, 7 }
  0x54   : > { %s2341_s13 = smul.u32 24, %s411_s28  ;;  %2138 = vmatpush3.bf16.msra.mxu0 %v2135_v3  ;;  %v419_v20 = vld [vmem:[#allocation2 + $0x8] sm:$0xff]  ;;  %v421_v23 = vld [vmem:[#allocation2 + $0x18] sm:$0xff]  ;;  %v422_v27 = vld [vmem:[#allocation2 + $0x20] sm:$0xff]  ;;  %s1684_s30 = sshll.u32 %s407_s25, 3  ;;  %vm1579_vm7 = vcmask 523264  }
  0x55   : > { %2140 = vmatprep.subr.bf16.mxu0 %v2139_v5  ;;  %v2151_v24 = vpack.c.bf16 %v419_v20, %v418_v19  ;;  %v2155_v26 = vpack.c.bf16 %v421_v23, %v420_v22  ;;  %v423_v28 = vld [vmem:[#allocation2 + $0x28] sm:$0xff]  ;;  %v424_v30 = vld [vmem:[#allocation2 + $0x30] sm:$0xff]  ;;  %v425_v31 = vld [vmem:[#allocation2 + $0x38] sm:$0xff]  ;;  %s409_s23 = scalar_lea.vmem [#allocation7], %s1684_s30  ;;  %s3029_s15 = scalar_lea.hbm %s3082_s11, %s1738_s17 }
  0x56   : > { %s414_s16 = scalar_lea.vmem %s3071_s0, %s2341_s13  ;;  %v2159_v29 = vpack.c.bf16 %v423_v28, %v422_v27  ;;  %v2163_v32 = vpack.c.bf16 %v425_v31, %v424_v30  ;;  %v426_v33 = vld [vmem:[#allocation2 + $0x40] sm:$0xff]  ;;  %v606_v34 = vld [vmem:[#allocation2 + $0x90] sm:$0xff]  ;;  %v607_v35 = vld [vmem:[#allocation2 + $0x98] sm:$0xff]  ;;  %s1595_s28 = sshll.u32 %s409_s23, 4  ;;  %s3031_s28 = int_to_ptr.vmem [resolvable:$true] %s1595_s28 }
  0x57   : > { %v2728_v8 = vld [vmem:[%s414_s16] sm:$0xff]  ;;  %v2730_v9 = vld [vmem:[%s414_s16 + $0x8] sm:$0xff]  ;;  %v2736_v17 = vld [vmem:[%s414_s16 + $0x10] sm:$0x3]  ;;  %v2167_v40 = vpack.c.bf16 %v607_v35, %v606_v34  ;;  %s1582_s16 = scalar_lea.sflag [#allocation4], %s407_s25  ;;  %s2463_s22 = scalar_lea.vmem %s3031_s28, 128 }
  0x58   : > { %v441_v10 = vrot.slane %v2728_v8, 1  ;;  %v442_v11 = vrot.slane %v2730_v9, 1  ;;  %2142 = vmatpush3.bf16.msra.mxu0 %v2139_v5  ;;  %v444_v21 = vrot.slane %v2736_v17, 1  ;;  %v616_v36 = vrot.slane %v2728_v8, 2  ;;  %v608_v38 = vld [vmem:[#allocation2 + $0xa0] sm:$0xff]  ;;  %v609_v39 = vld [vmem:[#allocation2 + $0xa8] sm:$0xff]  ;;  %p2464_p12 = scmp.ne.s32.totalorder %s3031_s28, %s2463_s22 }
  0x59   : > { %2144 = vmatprep.subr.bf16.mxu0 %v2143_v12  ;;  %v617_v37 = vrot.slane %v2730_v9, 2  ;;  %v2171_v41 = vpack.c.bf16 %v609_v39, %v608_v38  ;;  %v610_v43 = vld [vmem:[#allocation2 + $0xb0] sm:$0xff]  ;;  %v611_v44 = vld [vmem:[#allocation2 + $0xb8] sm:$0xff]  ;;  %v612_v46 = vld [vmem:[#allocation2 + $0xc0] sm:$0xff]  ;;  %v619_v50 = vrot.slane %v2736_v17, 2  ;;  %p3105_p1 = scmp.ne.s32.totalorder %s3095_s27, 0 }
  0x5a   : > { %v443_v15 = vsel %vm440_vm0, %v441_v10, %v442_v11  ;;  %v445_v25 = vsel %vm440_vm0, %v442_v11, %v444_v21  ;;  %v2175_v45 = vpack.c.bf16 %v611_v44, %v610_v43  ;;  %v613_v47 = vld [vmem:[#allocation2 + $0xc8] sm:$0xff]  ;;  %v614_v49 = vld [vmem:[#allocation2 + $0xd0] sm:$0xff]  ;;  %v713_v52 = vld [vmem:[#allocation5] sm:$0xff]  ;;  %s2542_s21 = smov [#allocation7]  }
  0x5b   : > { %1892 = vmatprep.mubr.msk.f32.mxu0 %vm446_vm1, %v443_v15  ;;  %v618_v42 = vsel %vm615_vm2, %v616_v36, %v617_v37  ;;  %v2179_v48 = vpack.c.bf16 %v613_v47, %v612_v46  ;;  %v620_v51 = vsel %vm615_vm2, %v617_v37, %v619_v50  ;;  %1941 = vmatprep.mubr.msk.f32.mxu1 %vm715_vm3, %v713_v52  ;;  %v1065_v53 = vld [vmem:[#allocation5 + $0x20] sm:$0xff]  ;;  %v1692_v54 = vld [vmem:[%s3079_s8] ss:$0 sm:$0xff]  ;;  %v1698_v63 = vld [vmem:[%s3074_s3 + $0x88] sm:$0xff]  ;;  %p2465_p2 = pnand %p2464_p12, %p3105_p1  ;;  %s2467_s19 = sshll.u32 %s2542_s21, 4  ;;  %s2468_s19 = int_to_ptr.vmem [resolvable:$false] %s2467_s19 }
  0x5c   : > { %2146 = vmatpush3.bf16.msra.mxu0 %v2143_v12  ;;  %v1697_v62 = vld [vmem:[%s3074_s3 + $0x80] sm:$0xff]  ;;  %v814_v2 = vld [vmem:[#allocation5 + $0x10] sm:$0xff]  ;;  %v1699_v4 = vld [vmem:[%s3074_s3 + $0x90] sm:$0xff]  ;;  %s2469_s26 = scalar_lea.vmem %s2468_s19, 256  ;;  %p2470_p4 = scmp.lt.s32.totalorder %s3031_s28, %s2468_s19 }
  0x5d   : > { %2148 = vmatprep.subr.bf16.mxu0 %v2147_v16  ;;  %v714_v0 = vld [vmem:[#allocation5 + $0x8] sm:$0xff]  ;;  %v2191_v3 = vpack.c.bf16 %v1698_v63, %v1697_v62  ;;  %v1700_v5 = vld [vmem:[%s3074_s3 + $0x98] sm:$0xff]  ;;  %v815_v6 = vld [vmem:[#allocation5 + $0x18] sm:$0xff]  ;;  %p2466_p3 = pneg %p2465_p2  ;;  %p2471_p7 = scmp.lt.s32.totalorder %s2469_s26, %s2463_s22 }
  0x5e   : > { %v1066_v1 = vld [vmem:[#allocation5 + $0x28] sm:$0xff]  ;;  %v2195_v7 = vpack.c.bf16 %v1700_v5, %v1699_v4  ;;  %v1702_v11 = vld [vmem:[%s3074_s3 + $0xa8] sm:$0xff]  ;;  %v1703_v13 = vld [vmem:[%s3074_s3 + $0xb0] sm:$0xff] }
  0x5f   : > { %v1701_v10 = vld [vmem:[%s3074_s3 + $0xa0] sm:$0xff]  ;;  %v1704_v14 = vld [vmem:[%s3074_s3 + $0xb8] sm:$0xff]  ;;  %v1707_v20 = vld [vmem:[%s3074_s3 + $0xd0] sm:$0xff]  ;;  %p2472_p8 = por %p2471_p7, %p2470_p4 }
  0x60   : > { %2150 = vmatpush3.bf16.msra.mxu0 %v2147_v16  ;;  %v2199_v12 = vpack.c.bf16 %v1702_v11, %v1701_v10  ;;  %v2203_v15 = vpack.c.bf16 %v1704_v14, %v1703_v13  ;;  %v1705_v16 = vld [vmem:[%s3074_s3 + $0xc0] sm:$0xff]  ;;  %v1708_v21 = vld [vmem:[%s3074_s3 + $0xd8] sm:$0xff]  ;;  %v798_v30 = vld [vmem:[%s3074_s3 + $0x8] sm:$0xff] }
  0x61   : > { %1890 = vmatprep.subr.mxu0 %v436_v18  ;;  %v2211_v22 = vpack.c.bf16 %v1708_v21, %v1707_v20  ;;  %v1709_v23 = vld [vmem:[%s3074_s3 + $0xe0] sm:$0xff]  ;;  %v1712_v27 = vld [vmem:[%s3074_s3 + $0xf8] sm:$0xff]  ;;  %v799_v38 = vld [vmem:[%s3074_s3 + $0x10] sm:$0xff]  ;;  %p2473_p11 = pnand %p2472_p8, %p2466_p3 }
  0x62   : > { %v800_v39 = vld [vmem:[%s3074_s3 + $0x18] sm:$0xff]  ;;  %v801_v43 = vld [vmem:[%s3074_s3 + $0x20] sm:$0xff]  ;;  %v802_v44 = vld [vmem:[%s3074_s3 + $0x28] sm:$0xff] }
  0x63   : > { %v803_v46 = vld [vmem:[%s3074_s3 + $0x30] sm:$0xff]  ;;  %v804_v47 = vld [vmem:[%s3074_s3 + $0x38] sm:$0xff]  ;;  %v806_v50 = vld [vmem:[%s3074_s3 + $0x48] sm:$0xff] }
  0x64   : > { %1891 = vmatpush3.msra.mxu0 %v436_v18  ;;  %v1706_v18 = vld [vmem:[%s3074_s3 + $0xc8] sm:$0xff]  ;;  %v807_v52 = vld [vmem:[%s3074_s3 + $0x50] sm:$0xff]  ;;  %v1723_v11 = vld [vmem:[%s3074_s3 + $0x140] sm:$0xff] }
  0x65   : > { %2152 = vmatprep.subr.bf16.mxu0 %v2151_v24  ;;  %1893 = vmatmul.mubr.msk.f32.vlgmr.msra.gmra.mrb[0].mxu0 %vm446_vm1, %v445_v25  ;;  %v2207_v19 = vpack.c.bf16 %v1706_v18, %v1705_v16  ;;  %v1716_v62 = vld [vmem:[%s3074_s3 + $0x108] sm:$0xff]  ;;  %v1725_v14 = vld [vmem:[%s3074_s3 + $0x150] sm:$0xff]  ;;  %v1727_v18 = vld [vmem:[%s3074_s3 + $0x160] sm:$0xff] }
  0x66   : > { %2154 = vmatpush3.bf16.msra.mxu0 %v2151_v24  ;;  %1913 = vmatprep.mubr.msk.f32.mxu0 %vm446_vm1, %v2728_v8  ;;  %v1710_v24 = vld [vmem:[%s3074_s3 + $0xe8] sm:$0xff]  ;;  %v1729_v21 = vld [vmem:[%s3074_s3 + $0x170] sm:$0xff] }
  0x67   : > { %2156 = vmatprep.subr.bf16.mxu0 %v2155_v26  ;;  %v2215_v25 = vpack.c.bf16 %v1710_v24, %v1709_v23  ;;  %v1720_v4 = vld [vmem:[%s3074_s3 + $0x128] sm:$0xff]  ;;  %v2295_v24 = vpack.c.bf16 %v2730_v9, %v2728_v8  ;;  %v1731_v8 = vld [vmem:[%s3080_s9] ss:$0 sm:$0xff] }
  0x6a   : > { %2158 = vmatpush3.bf16.msra.mxu0 %v2155_v26  ;;  %v1711_v26 = vld [vmem:[%s3074_s3 + $0xf0] sm:$0xff] }
  0x6b   : > { %2160 = vmatprep.subr.bf16.mxu0 %v2159_v29  ;;  %v2219_v28 = vpack.c.bf16 %v1712_v27, %v1711_v26 }
  0x6e   : > { %2162 = vmatpush3.bf16.msra.mxu0 %v2159_v29  ;;  %v797_v29 = vld [vmem:[%s3074_s3] sm:$0xff] }
  0x6f   : > { %2164 = vmatprep.subr.bf16.mxu0 %v2163_v32  ;;  %v2223_v31 = vpack.c.bf16 %v798_v30, %v797_v29  ;;  %v1419_v29 = vld [vmem:[%s3078_s7] sm:$0xff]  ;;  %v1420_v30 = vld [vmem:[%s3078_s7 + $0x8] sm:$0xff] }
  0x72   : > { %2166 = vmatpush3.bf16.msra.mxu0 %v2163_v32  ;;  %v2539_v32 = vmov 0.0|0.0  }
  0x73   : > { %1911 = vmatprep.subr.mxu0 %v426_v33 }
  0x76   : > { %1912 = vmatpush3.msra.mxu0 %v426_v33  ;;  %v2541_v33 = vmov 0.0  }
  0x77   : > { %2168 = vmatprep.subr.bf16.mxu0 %v2167_v40  ;;  %1914 = vmatmul.mubr.msk.f32.vlgmr.msra.gmra.mrb[0].mxu0 %vm446_vm1, %v2730_v9 }
  0x78   : > { %2170 = vmatpush3.bf16.msra.mxu0 %v2167_v40  ;;  %1934 = vmatprep.mubr.msk.f32.mxu0 %vm446_vm1, %v618_v42  ;;  %v2227_v42 = vpack.c.bf16 %v800_v39, %v799_v38 }
  0x79   : > { %2172 = vmatprep.subr.bf16.mxu0 %v2171_v41 }
  0x7c   : > { %2174 = vmatpush3.bf16.msra.mxu0 %v2171_v41 }
  0x7d   : > { %2176 = vmatprep.subr.bf16.mxu0 %v2175_v45 }
  0x80   : > { %2178 = vmatpush3.bf16.msra.mxu0 %v2175_v45  ;;  %v2231_v45 = vpack.c.bf16 %v802_v44, %v801_v43  ;;  %v1425_v43 = vld [vmem:[%s3078_s7 + $0x30] sm:$0xff]  ;;  %v1426_v44 = vld [vmem:[%s3078_s7 + $0x38] sm:$0xff] }
  0x81   : > { %2180 = vmatprep.subr.bf16.mxu0 %v2179_v48 }
  0x84   : > { %2182 = vmatpush3.bf16.msra.mxu0 %v2179_v48  ;;  %v2235_v48 = vpack.c.bf16 %v804_v47, %v803_v46  ;;  %v1325_v46 = vld [vmem:[%s3076_s5] sm:$0xff]  ;;  %v1326_v47 = vld [vmem:[%s3076_s5 + $0x8] sm:$0xff] }
  0x85   : > { %1932 = vmatprep.subr.mxu0 %v614_v49 }
  0x88   : > { %1933 = vmatpush3.msra.mxu0 %v614_v49  ;;  %v805_v49 = vld [vmem:[%s3074_s3 + $0x40] sm:$0xff] }
  0x89   : > { %1935 = vmatmul.mubr.msk.f32.vlgmr.msra.gmra.mrb[0].mxu0 %vm446_vm1, %v620_v51  ;;  %v2239_v51 = vpack.c.bf16 %v806_v50, %v805_v49  ;;  %v2310_v49 = vpack.c.bf16 %v1326_v47, %v1325_v46  ;;  %v1327_v50 = vld [vmem:[%s3076_s5 + $0x10] sm:$0xff] }
  0x8a   : > { %2025 = vmatprep.mubr.msk.f32.mxu0 %vm715_vm3, %v1065_v53  ;;  %v808_v53 = vld [vmem:[%s3074_s3 + $0x58] sm:$0xff] }
 0x15c   : > { %v1936_v55 = vpop.f32.mrb[0].mxu0 }
 0x15d   : > { %v710_v56 = vadd.f32 %v1936_v55, %v1692_v54  ;;  %v691_v57 = vpop.f32.mrb[1].mxu0  ;;  %v809_v55 = vld [vmem:[%s3074_s3 + $0x60] sm:$0xff] }
 0x15e   : > { %v709_v58 = vadd.f32 %v1692_v54, %v691_v57  ;;  %v2243_v54 = vpack.c.bf16 %v808_v53, %v807_v52  ;;  %v1329_v53 = vld [vmem:[%s3076_s5 + $0x20] sm:$0xff] }
 0x15f   : > { %v712_v59 = vmax.f32 %v710_v56, 0.0  ;;  %v810_v56 = vld [vmem:[%s3074_s3 + $0x68] sm:$0xff] }
 0x160   : > { %v711_v60 = vmax.f32 %v709_v58, 0.0  ;;  %v2247_v57 = vpack.c.bf16 %v810_v56, %v809_v55  ;;  %v811_v58 = vld [vmem:[%s3074_s3 + $0x70] sm:$0xff] }
 0x161   : > { %v1331_v56 = vld [vmem:[%s3076_s5 + $0x30] sm:$0xff] }
 0x162   : > { %v2183_v61 = vpack.c.bf16 %v712_v59, %v711_v60  ;;  %v812_v59 = vld [vmem:[%s3074_s3 + $0x78] sm:$0xff] }
 0x163   : > { %v2251_v60 = vpack.c.bf16 %v812_v59, %v811_v58  ;;  %v1333_v58 = vld [vmem:[%s3076_s5 + $0x40] sm:$0xff]  ;;  %v1334_v59 = vld [vmem:[%s3076_s5 + $0x48] sm:$0xff] }
 0x164   : > { %2184 = vmatprep.subr.bf16.mxu1 %v2183_v61  ;;  %2256 = vmatprep.subr.bf16.mxu0 %v2183_v61 }
 0x165   : > { %2186 = vmatpush3.bf16.msra.mxu1 %v2183_v61  ;;  %2258 = vmatpush3.bf16.msra.mxu0 %v2183_v61 }
 0x166   : > { %2188 = vmatprep.subr.bf16.mxu1 %v2183_v61  ;;  %2291 = vmatprep.subr.bf16.mxu0 %v2539_v32 }
 0x168   : > { %1942 = vmatmul.mubr.msk.f32.vlgmr.msra.gmra.mrb[0].mxu1 %vm715_vm3, %v714_v0  ;;  %2026 = vmatmul.mubr.msk.f32.vlgmr.msra.gmra.mrb[2].mxu0 %vm715_vm3, %v1066_v1  ;;  %v1717_v0 = vld [vmem:[%s3074_s3 + $0x110] sm:$0xff]  ;;  %v1718_v1 = vld [vmem:[%s3074_s3 + $0x118] sm:$0xff] }
 0x169   : > { %2190 = vmatpush3.bf16.msra.mxu1 %v2183_v61  ;;  %1948 = vmatprep.mubr.msk.f32.mxu1 %vm715_vm3, %v814_v2  ;;  %v1715_v61 = vld [vmem:[%s3074_s3 + $0x100] sm:$0xff]  ;;  %v2263_v2 = vpack.c.bf16 %v1718_v1, %v1717_v0  ;;  %v1338_v1 = vld [vmem:[%s3076_s5 + $0x68] sm:$0xff] }
 0x16a   : > { %2192 = vmatprep.subr.bf16.mxu1 %v2191_v3  ;;  %2067 = vmatprep.mubr.msk.f32.mxu0 %vm2540_vm4, %v2541_v33  ;;  %v2259_v63 = vpack.c.bf16 %v1716_v62, %v1715_v61  ;;  %v1335_v61 = vld [vmem:[%s3076_s5 + $0x50] sm:$0xff]  ;;  %v1336_v62 = vld [vmem:[%s3076_s5 + $0x58] sm:$0xff]  ;;  %v1337_v0 = vld [vmem:[%s3076_s5 + $0x60] sm:$0xff] }
 0x16c   : > { %1949 = vmatmul.mubr.msk.f32.vlgmr.msra.gmra.mrb[2].mxu1 %vm715_vm3, %v815_v6  ;;  %v1721_v6 = vld [vmem:[%s3074_s3 + $0x130] sm:$0xff] }
 0x16d   : > { %2194 = vmatpush3.bf16.msra.mxu1 %v2191_v3  ;;  %v1719_v3 = vld [vmem:[%s3074_s3 + $0x120] sm:$0xff] }
 0x16e   : > { %2196 = vmatprep.subr.bf16.mxu1 %v2195_v7  ;;  %v2267_v5 = vpack.c.bf16 %v1720_v4, %v1719_v3  ;;  %v1339_v3 = vld [vmem:[%s3076_s5 + $0x70] sm:$0xff]  ;;  %v1340_v4 = vld [vmem:[%s3076_s5 + $0x78] sm:$0xff] }
 0x171   : > { %2198 = vmatpush3.bf16.msra.mxu1 %v2195_v7  ;;  %v1722_v7 = vld [vmem:[%s3074_s3 + $0x138] sm:$0xff] }
 0x172   : > { %2200 = vmatprep.subr.bf16.mxu1 %v2199_v12  ;;  %v2271_v10 = vpack.c.bf16 %v1722_v7, %v1721_v6 }
 0x175   : > { %2202 = vmatpush3.bf16.msra.mxu1 %v2199_v12  ;;  %v1724_v12 = vld [vmem:[%s3074_s3 + $0x148] sm:$0xff] }
 0x176   : > { %2204 = vmatprep.subr.bf16.mxu1 %v2203_v15  ;;  %v2275_v13 = vpack.c.bf16 %v1724_v12, %v1723_v11 }
 0x179   : > { %2206 = vmatpush3.bf16.msra.mxu1 %v2203_v15  ;;  %v1726_v15 = vld [vmem:[%s3074_s3 + $0x158] sm:$0xff] }
 0x17a   : > { %2208 = vmatprep.subr.bf16.mxu1 %v2207_v19  ;;  %v2279_v16 = vpack.c.bf16 %v1726_v15, %v1725_v14 }
 0x17d   : > { %2210 = vmatpush3.bf16.msra.mxu1 %v2207_v19  ;;  %v1728_v19 = vld [vmem:[%s3074_s3 + $0x168] sm:$0xff] }
 0x17e   : > { %2212 = vmatprep.subr.bf16.mxu1 %v2211_v22  ;;  %v2283_v20 = vpack.c.bf16 %v1728_v19, %v1727_v18 }
 0x181   : > { %2214 = vmatpush3.bf16.msra.mxu1 %v2211_v22  ;;  %v1730_v22 = vld [vmem:[%s3074_s3 + $0x178] sm:$0xff] }
 0x182   : > { %2216 = vmatprep.subr.bf16.mxu1 %v2215_v25  ;;  %v2287_v23 = vpack.c.bf16 %v1730_v22, %v1729_v21 }
 0x185   : > { %2218 = vmatpush3.bf16.msra.mxu1 %v2215_v25  ;;  %v1341_v25 = vld [vmem:[%s3077_s6] sm:$0xff] }
 0x186   : > { %2220 = vmatprep.subr.bf16.mxu1 %v2219_v28 }
 0x189   : > { %2222 = vmatpush3.bf16.msra.mxu1 %v2219_v28 }
 0x18a   : > { %2224 = vmatprep.subr.bf16.mxu1 %v2223_v31 }
 0x23b   : > { %v1943_v34 = vpop.f32.mrb[0].mxu1  ;;  %v2818_v35 = vpop.f32.mrb[2].mxu0 }
 0x23c   : > { %v788_v36 = vpop.f32.mrb[1].mxu1  ;;  %v1139_v37 = vpop.f32.mrb[3].mxu0 }
 0x23f   : > { %v1950_v40 = vpop.f32.mrb[2].mxu1 }
 0x240   : > { %v888_v41 = vpop.f32.mrb[3].mxu1 }
 0x241   : > { %1983 = vmatprep.mubr.f32.mxu1 %v888_v41  ;;  %v1424_v41 = vld [vmem:[%s3078_s7 + $0x28] sm:$0xff] }
 0x242   : > { %1984 = vmatmul.mubr.f32.vlgmr.msra.gmra.mrb[4].mxu1 %v1950_v40  ;;  %v1423_v40 = vld [vmem:[%s3078_s7 + $0x20] sm:$0xff] }
 0x243   : > { %2226 = vmatpush3.bf16.msra.mxu1 %v2223_v31  ;;  %2018 = vmatprep.mubr.f32.mxu1 %v788_v36  ;;  %v1421_v36 = vld [vmem:[%s3078_s7 + $0x10] sm:$0xff] }
 0x244   : > { %2228 = vmatprep.subr.bf16.mxu1 %v2227_v42 }
 0x247   : > { %2230 = vmatpush3.bf16.msra.mxu1 %v2227_v42  ;;  %v2304_v42 = vpack.c.bf16 %v1424_v41, %v1423_v40 }
 0x248   : > { %2232 = vmatprep.subr.bf16.mxu1 %v2231_v45 }
 0x24b   : > { %2234 = vmatpush3.bf16.msra.mxu1 %v2231_v45  ;;  %v2307_v45 = vpack.c.bf16 %v1426_v44, %v1425_v43 }
 0x24c   : > { %2236 = vmatprep.subr.bf16.mxu1 %v2235_v48 }
 0x24f   : > { %2238 = vmatpush3.bf16.msra.mxu1 %v2235_v48  ;;  %v1427_v48 = vld [vmem:[%s3078_s7 + $0x40] sm:$0xff] }
 0x250   : > { %2240 = vmatprep.subr.bf16.mxu1 %v2239_v51 }
 0x253   : > { %2242 = vmatpush3.bf16.msra.mxu1 %v2239_v51  ;;  %v1328_v51 = vld [vmem:[%s3076_s5 + $0x18] sm:$0xff] }
 0x254   : > { %2244 = vmatprep.subr.bf16.mxu1 %v2243_v54  ;;  %v2313_v52 = vpack.c.bf16 %v1328_v51, %v1327_v50 }
 0x257   : > { %2246 = vmatpush3.bf16.msra.mxu1 %v2243_v54  ;;  %v1330_v54 = vld [vmem:[%s3076_s5 + $0x28] sm:$0xff] }
 0x258   : > { %2248 = vmatprep.subr.bf16.mxu1 %v2247_v57  ;;  %v2316_v55 = vpack.c.bf16 %v1330_v54, %v1329_v53 }
 0x25b   : > { %2250 = vmatpush3.bf16.msra.mxu1 %v2247_v57 }
 0x25c   : > { %2252 = vmatprep.subr.bf16.mxu1 %v2251_v60 }
 0x25f   : > { %2254 = vmatpush3.bf16.msra.mxu1 %v2251_v60  ;;  %v2322_v60 = vpack.c.bf16 %v1334_v59, %v1333_v58 }
 0x260   : > { %2260 = vmatprep.subr.bf16.mxu1 %v2259_v63 }
 0x262   : > { %2019 = vmatmul.mubr.f32.vlgmr.msra.gmra.mrb[4].mxu1 %v1943_v34  ;;  %v2298_v34 = vpack.c.bf16 %v1420_v30, %v1419_v29 }
 0x263   : > { %2262 = vmatpush3.bf16.msra.mxu1 %v2259_v63  ;;  %2060 = vmatprep.mubr.f32.mxu1 %v1139_v37  ;;  %v1422_v37 = vld [vmem:[%s3078_s7 + $0x18] sm:$0xff]  ;;  %v2325_v63 = vpack.c.bf16 %v1336_v62, %v1335_v61 }
 0x264   : > { %2264 = vmatprep.subr.bf16.mxu1 %v2263_v2  ;;  %v2301_v39 = vpack.c.bf16 %v1422_v37, %v1421_v36 }
 0x267   : > { %2266 = vmatpush3.bf16.msra.mxu1 %v2263_v2  ;;  %v2328_v2 = vpack.c.bf16 %v1338_v1, %v1337_v0 }
 0x268   : > { %2268 = vmatprep.subr.bf16.mxu1 %v2267_v5 }
 0x26b   : > { %2270 = vmatpush3.bf16.msra.mxu1 %v2267_v5  ;;  %v2331_v5 = vpack.c.bf16 %v1340_v4, %v1339_v3 }
 0x26c   : > { %2272 = vmatprep.subr.bf16.mxu1 %v2271_v10 }
 0x26f   : > { %2274 = vmatpush3.bf16.msra.mxu1 %v2271_v10 }
 0x270   : > { %2276 = vmatprep.subr.bf16.mxu1 %v2275_v13 }
 0x273   : > { %2278 = vmatpush3.bf16.msra.mxu1 %v2275_v13  ;;  %v1736_v13 = vld [vmem:[%s3081_s10] ss:$0 sm:$0xff] }
 0x274   : > { %2280 = vmatprep.subr.bf16.mxu1 %v2279_v16 }
 0x277   : > { %2282 = vmatpush3.bf16.msra.mxu1 %v2279_v16 }
 0x278   : > { %2284 = vmatprep.subr.bf16.mxu1 %v2283_v20 }
 0x27b   : > { %2286 = vmatpush3.bf16.msra.mxu1 %v2283_v20 }
 0x27c   : > { %2288 = vmatprep.subr.bf16.mxu1 %v2287_v23 }
 0x27f   : > { %2290 = vmatpush3.bf16.msra.mxu1 %v2287_v23 }
 0x280   : > { %2294 = vmatprep.subr.bf16.mxu1 %v2539_v32 }
 0x282   : > { %2061 = vmatmul.mubr.f32.vlgmr.msra.gmra.mrb[4].mxu1 %v2818_v35 }
 0x283   : > { %2296 = vmatpush3.bf16.msra.mxu1 %v2295_v24  ;;  %2076 = vmatprep.mubr.msk.f32.mxu1 %vm2540_vm4, %v2541_v33 }
 0x284   : > { %2074 = vmatprep.subr.mxu1 %v2541_v33 }
 0x287   : > { %2075 = vmatpush3.msk.msra.mxu1 %vm1346_vm5, %v2736_v17  ;;  %v1251_v17 = vld [vmem:[%s3075_s4] sm:$0xff] }
 0x288   : > { %2077 = vmatmul.mubr.msk.f32.vlgmr.msra.gmra.mrb[6].mxu1 %vm1342_vm6, %v1341_v25 }
 0x355   : > { %v2062_v9 = vpop.f32.mrb[4].mxu1 }
 0x356   : > { %v1250_v26 = vadd.f32 %v2062_v9, %v1731_v8  ;;  %v1231_v27 = vpop.f32.mrb[5].mxu1 }
 0x357   : > { %v1249_v28 = vadd.f32 %v1731_v8, %v1231_v27 }
 0x359   : > { %v2292_v31 = vpack.c.bf16 %v1250_v26, %v1249_v28 }
 0x35b   : > { %2293 = vmatpush3.bf16.msra.mxu0 %v2292_v31  ;;  %v1415_v35 = vpop.f32.mrb[6].mxu1 }
 0x35c   : > { %2297 = vmatprep.subr.bf16.mxu0 %v2539_v32  ;;  %v2078_v38 = vpop.f32.mrb[7].mxu1 }
 0x35e   : > { %2068 = vmatmul.mubr.msk.f32.vlgmr.msra.gmra.mrb[4].mxu0 %vm715_vm3, %v1251_v17 }
 0x35f   : > { %2299 = vmatpush3.bf16.msra.mxu0 %v2298_v34  ;;  %2097 = vmatprep.mubr.msk.f32.mxu0 %vm2540_vm4, %v2541_v33 }
 0x360   : > { %2300 = vmatprep.subr.bf16.mxu0 %v2539_v32 }
 0x363   : > { %2302 = vmatpush3.bf16.msra.mxu0 %v2301_v39 }
 0x364   : > { %2303 = vmatprep.subr.bf16.mxu0 %v2539_v32 }
 0x367   : > { %2305 = vmatpush3.bf16.msra.mxu0 %v2304_v42 }
 0x368   : > { %2306 = vmatprep.subr.bf16.mxu0 %v2539_v32 }
 0x36b   : > { %2308 = vmatpush3.bf16.msra.mxu0 %v2307_v45 }
 0x36c   : > { %2095 = vmatprep.subr.mxu0 %v2541_v33 }
 0x36f   : > { %2096 = vmatpush3.msra.mxu0 %v1427_v48 }
 0x370   : > { %2309 = vmatprep.subr.bf16.mxu0 %v2539_v32  ;;  %2098 = vmatmul.mubr.msk.f32.vlgmr.msra.gmra.mrb[6].mxu0 %vm446_vm1, %v1415_v35 }
 0x371   : > { %2311 = vmatpush3.bf16.msra.mxu0 %v2310_v49  ;;  %2132 = vmatprep.mubr.msk.f32.mxu0 %vm2540_vm4, %v2541_v33  ;;  %v1332_v33 = vld [vmem:[%s3076_s5 + $0x38] sm:$0xff] }
 0x372   : > { %2312 = vmatprep.subr.bf16.mxu0 %v2539_v32  ;;  %v2319_v57 = vpack.c.bf16 %v1332_v33, %v1331_v56 }
 0x375   : > { %2314 = vmatpush3.bf16.msra.mxu0 %v2313_v52 }
 0x376   : > { %2315 = vmatprep.subr.bf16.mxu0 %v2539_v32 }
 0x379   : > { %2317 = vmatpush3.bf16.msra.mxu0 %v2316_v55 }
 0x37a   : > { %2318 = vmatprep.subr.bf16.mxu0 %v2539_v32 }
 0x37d   : > { %2320 = vmatpush3.bf16.msra.mxu0 %v2319_v57 }
 0x37e   : > { %2321 = vmatprep.subr.bf16.mxu0 %v2539_v32 }
 0x381   : > { %2323 = vmatpush3.bf16.msra.mxu0 %v2322_v60 }
 0x382   : > { %2324 = vmatprep.subr.bf16.mxu0 %v2539_v32 }
 0x385   : > { %2326 = vmatpush3.bf16.msra.mxu0 %v2325_v63 }
 0x386   : > { %2327 = vmatprep.subr.bf16.mxu0 %v2539_v32 }
 0x389   : > { %2329 = vmatpush3.bf16.msra.mxu0 %v2328_v2 }
 0x38a   : > { %2330 = vmatprep.subr.bf16.mxu0 %v2539_v32 }
 0x38d   : > { %2332 = vmatpush3.bf16.msra.mxu0 %v2331_v5 }
 0x431   : > { %v1321_v6 = vpop.f32.mrb[4].mxu0 }
 0x432   : > { %v2069_v7 = vpop.f32.mrb[5].mxu0  ;;  %2133 = vmatmul.mubr.f32.vlgmr.msra.gmra.mrb[8].mxu0 %v1321_v6 }
 0x443   : > { %v1497_v10 = vpop.f32.mrb[6].mxu0 }
 0x444   : > { %v2099_v11 = vpop.f32.mrb[7].mxu0 }
 0x505   : > { %v1567_v12 = vpop.f32.mrb[8].mxu0 }
 0x506   : > { %v1568_v14 = vadd.f32 %v1567_v12, %v1497_v10  ;;  %v2134_v15 = vpop.f32.mrb[9].mxu0 }
 0x508   : > { %v1578_v32 = vadd.f32 %v1736_v13, %v1568_v14 }
 0x50a   : > { %1580 = vst.msk [vmem:[%s409_s23] sm:$0xff] %vm1579_vm7, %v1578_v32 }
 0x50b   : > { %2476 = shalt.err (!%p2473_p11)
}
 0x50c   : > { %s2477_s24 = scalar_lea.hbm %s3029_s15, 128  ;;  %s2481_s14 = scalar_lea.hbm %s3082_s11, 256 }
 0x50d   : > { %p2478_p13 = scmp.ne.s32.totalorder %s3029_s15, %s2477_s24  ;;  %p2482_p6 = scmp.lt.u32.totalorder %s3029_s15, %s3082_s11 }
 0x50e   : > { %p2483_p9 = scmp.lt.u32.totalorder %s2481_s14, %s2477_s24  ;;  %p2485_p12 = scmp.lt.u32.totalorder %s2477_s24, %s3029_s15 }
 0x50f   : > { %p2479_p5 = pnand %p2478_p13, %p3105_p1 }
 0x510   : > { %p2484_p10 = por %p2483_p9, %p2482_p6 }
 0x511   : > { %p2480_p0 = pneg %p2479_p5 }
 0x512   : > { %p2486_p2 = por %p2485_p12, %p2484_p10 }
 0x514   : > { %p2487_p3 = pnand %p2486_p2, %p2480_p0 }
 0x516   : > { %2490 = shalt.err (!%p2487_p3)
}
 0x517   : > { %2350 = dma.vmem_to_hbm [thread:$0]  (%p3105_p1), %s3031_s28, 128, %s3029_s15, %s1582_s16  }
 0x518 PF: > { %s3106_s23 = sld [smem:[#allocation11_spill]]  ;;  %s3107_s13 = sld [smem:[#allocation15_spill]] }
 0x519   : > { %p2367_p4 = scmp.ge.s32.totalorder %s2533_s20, 2 }
 0x51e   : > { %s1607_s29 = sand.u32 1, %s3106_s23   ;;  %p3108_p7 = scmp.ne.s32.totalorder %s3107_s13, 0 }
 0x51f   : > { %s1608_s22 = scalar_lea.sflag [#allocation4], %s1607_s29 }
 0x520   : > { %p2360_p8 = pnand %p2367_p4, %p3108_p7 }
 0x522   : > { %2516 = dma.done.wait (!%p2360_p8), %s1608_s22, 128  }
 0x523   : > { %2518 = vsyncadd (!%p2360_p8), %s1608_s22, 4294967168  ;;  %s3109_s20 = sld [smem:[#allocation13_spill]]  ;;  %s3110_s21 = sld [smem:[#allocation12_spill]] }
 0x524   : > { %s3111_s19 = sld [smem:[#allocation14_spill]]  ;;  %s3112_s17 = smov %s2525_s18 }
 0x529   : > { %p23_p11 = scmp.ge.s32.totalorder %s3109_s20, 4   ;;  %s3113_s18 = smov %s3110_s21 }
 0x52b   :  { %25 = sbr.rel (!%p23_p11) target bundleno = 5 (0x5), region = 114 }
 0x532   :  { %1613 = vsyncpa [#allocation3], 1 }
 0x533   :  { %1615 = vsyncpa [#allocation3 + $0x1], 1 }
 0x534   :  { %1616 = vsyncpa [#allocation6], 1 }
 0x535   :  { %1617 = vsyncpa [#allocation4], 1 }
 0x536   :  { %1619 = vsyncpa [#allocation4 + $0x1], 1 }

</bundles_post_ra>
